<compile_context>
chip_gen: v6e
topology: v6e:2x2x1
jax: 0.10.0
libtpu: 0.0.40
codegen_flags: <defaults>
</compile_context>

<pallas_src>
import math

import numpy as np
import jax
import jax.numpy as jnp
from jax import lax
from jax.experimental import pallas as pl
from jax.experimental.pallas import tpu as pltpu

# ----- static configuration (mirrors EpiGNN __init__ arguments) -----
B = 2          # batch size
W = 16         # args.window (P)
M = 8          # data.m (number of regions)
K = 4          # args.k
HIDP = 2       # args.hidP
HIDA = 16      # args.hidA
NLAYER = 2     # args.n (number of GraphConvLayer blocks)
HW = 4         # args.hw
HIDR = K * 4 * HIDP + K   # = 36
BM = B * M
BN_EPS = 1e-5
_INV_BN_STD = 1.0 / math.sqrt(1.0 + BN_EPS)
_F32 = jnp.float32

# conv branches: (kernel_size, dilation, pooled)
BRANCHES = ((3, 1, True), (5, 1, True), (3, 2, True), (5, 2, True), (W, 1, False))
MAX_TAPS = max((W - d * (k - 1)) // HIDP for (k, d, p) in BRANCHES if p)   # 7
LANE = 128
CONV_COLS = MAX_TAPS * LANE      # 896 conv-matmul output lanes (7 tap blocks)
Z_LANE = HIDR                    # highway column: lane 36 of tap block 0

# weight-slab column offsets (contraction rows 0..127 of the slab's WSL block)
C_WQ, C_WK = 0, HIDA                         # fused projection block cols 0..127
C_GL1, C_GL2 = 2 * HIDA, 2 * HIDA + HIDR     # 32, 68
C_GNN0, C_GNN1 = 128, 256                    # GNN layer weights, 128-wide each
WSL_COLS = 384

# parameter-slab row offsets
R_CONV = 0                    # rows   0..15 : (W, CONV_COLS) conv (+highway) matrix
R_WSL = W                     # rows  16..143: (128, WSL_COLS) zero-padded weights
R_SPAT = R_WSL + LANE         # rows 144..159: block-diag spatial adjacency (BM, BM)
R_BLK = R_SPAT + BM           # rows 160..175: block-diagonal batch mask    (BM, BM)
R_SENC = R_BLK + BM           # rows 176..191: precomputed s_enc            (BM, 128)
R_MISC = R_SENC + BM          # rows 192..207: misc bias / weight rows      (16, 128)
SLAB_ROWS = R_MISC + 16       # 208 (multiple of 8 sublanes)
SLAB_COLS = CONV_COLS         # 896 (multiple of 128 lanes)

# rows inside the misc block
MS_SCALE, MS_PBIAS, MS_PROJB = 0, 1, 2        # post-pool BN scale / shift, proj bias
MS_TENCW, MS_TENCB = 3, 4                     # t_enc Linear(1, HIDR)
MS_GNNB0, MS_GNNB1 = 5, 6                     # GNN biases
MS_OUTN, MS_OUTF, MS_SCAL = 7, 8, 9           # output head rows, out_b + hw_b


def _elu(x):
    return jnp.where(x > 0, x, jnp.exp(jnp.minimum(x, 0.0)) - 1.0)


def epignn_kernel(x_ref, p_ref, out_ref):
    xb = x_ref[...]                                          # (BM, W)

    # ---- RegionAwareConv backbone + highway taps: ONE matmul ----
    conv = jnp.dot(xb, p_ref[R_CONV:R_CONV + W, :],
                   preferred_element_type=_F32)              # (BM, 896)
    z_col = conv[:, Z_LANE:Z_LANE + 1]                       # (BM, 1) highway pre-act

    # adaptive max-pool = max over MAX_TAPS lane-aligned 128-wide tap blocks
    pooled = conv[:, 0:LANE]
    for j in range(1, MAX_TAPS):
        pooled = jnp.maximum(pooled, conv[:, j * LANE:(j + 1) * LANE])

    misc = p_ref[R_MISC:R_MISC + 16, 0:LANE]                 # (16, 128) aligned load

    # eval-mode BatchNorm affine applied AFTER pooling (exact for negative gamma)
    temp = jnp.tanh(pooled * misc[MS_SCALE:MS_SCALE + 1, :]
                    + misc[MS_PBIAS:MS_PBIAS + 1, :])        # (BM, 128), lanes 36.. = 0

    # ---- fused WQ | WK | GraphLearner.linear1 | linear2 projection (+ biases) ----
    proj = (jnp.dot(temp, p_ref[R_WSL:R_WSL + LANE, 0:LANE],
                    preferred_element_type=_F32)
            + misc[MS_PROJB:MS_PROJB + 1, :])                # (BM, 128)
    q = proj[:, C_WQ:C_WQ + HIDA]
    k = proj[:, C_WK:C_WK + HIDA]
    nv1 = jnp.tanh(proj[:, C_GL1:C_GL1 + HIDR])
    nv2 = jnp.tanh(proj[:, C_GL2:C_GL2 + HIDR])

    blk = p_ref[R_BLK:R_BLK + BM, 0:BM]                      # (BM, BM) batch mask

    # ---- transmission-risk self-attention (per-batch bmm via block-diag mask) ----
    attn = lax.dot_general(q, k, (((1,), (1,)), ((), ())),
                           preferred_element_type=_F32) * blk
    ss = jnp.sum(attn * attn, axis=-1, keepdims=True)
    attn = attn * lax.rsqrt(jnp.maximum(ss, 1e-24))          # F.normalize(p=2, dim=-1)
    attn_sum = jnp.sum(attn, axis=-1, keepdims=True)         # (BM, 1)

    t_enc = (attn_sum * misc[MS_TENCW:MS_TENCW + 1, :]
             + misc[MS_TENCB:MS_TENCB + 1, :])
    feat_emb = temp + t_enc + p_ref[R_SENC:R_SENC + BM, 0:LANE]   # (BM, 128)

    # ---- GraphLearner adjacency; a21 == a12^T ----
    a12 = lax.dot_general(nv1, nv2, (((1,), (1,)), ((), ())),
                          preferred_element_type=_F32)
    learned = jnp.maximum(jnp.tanh(a12 - jnp.transpose(a12)), 0.0)

    # learned + precomputed sigmoid(d_gate * d d^T) * adj, then D^-1 * binarize
    adj_all = learned * blk + p_ref[R_SPAT:R_SPAT + BM, 0:BM]
    adj_bin = jnp.where(adj_all > 0, 1.0, adj_all)
    d_inv = pl.reciprocal(jnp.sum(adj_bin, axis=-1, keepdims=True) + 1e-12,
                          approx=True)
    laplace = d_inv * adj_bin                                 # (BM, BM) block-diag

    # ---- GraphConvLayer stack: ELU(L (h W) + b) ----
    node = feat_emb
    for (c0, brow) in ((C_GNN0, MS_GNNB0), (C_GNN1, MS_GNNB1)):
        support = jnp.dot(node, p_ref[R_WSL:R_WSL + LANE, c0:c0 + LANE],
                          preferred_element_type=_F32)
        node = _elu(jnp.dot(laplace, support, preferred_element_type=_F32)
                    + misc[brow:brow + 1, :])

    # ---- output head Linear([node|feat_emb], 1) as one lane reduction; + highway ----
    head = jnp.sum(node * misc[MS_OUTN:MS_OUTN + 1, :]
                   + feat_emb * misc[MS_OUTF:MS_OUTF + 1, :],
                   axis=-1, keepdims=True)                    # (BM, 1)
    out_ref[...] = head + z_col + misc[MS_SCAL:MS_SCAL + 1, 0:1]


def build_param_slab(adj, degree, params):
    """ONE-TIME host-side packing of all static data into a single slab.

    Builds the tap-blocked conv matrix (raw conv weights; BN scale/shift kept as
    post-pool rows so negative gammas stay exact), folds the highway head into an
    extra conv column, zero-pads every weight to 128-deep MXU contractions, and
    precomputes the batch mask / spatial adjacency / s_enc.
    """
    p = [np.asarray(a, dtype=np.float32) for a in params]
    it = iter(p)

    cm = np.zeros((W, CONV_COLS), np.float32)
    scale_row = np.zeros((LANE,), np.float32)
    pbias_row = np.zeros((LANE,), np.float32)
    g = 0
    for (ksz, dil, pooled) in BRANCHES:
        cw, cb, ga, be = next(it), next(it), next(it), next(it)
        t_out = W - dil * (ksz - 1)
        gsc = ga[0] * _INV_BN_STD                  # (K,) eval-mode BN scale
        if pooled:
            half = t_out // HIDP                   # taps per adaptive-max bin
            for c in range(K):
                for pbin in range(HIDP):
                    for j in range(MAX_TAPS):      # short bins duplicate a real tap
                        t = pbin * half + (j % half)
                        for kk in range(ksz):
                            cm[t + kk * dil, j * LANE + g] = cw[c, kk]
                    scale_row[g] = gsc[c]
                    pbias_row[g] = gsc[c] * cb[0, c] + be[0, c]
                    g += 1
        else:
            for c in range(K):                     # global branch: identical copies
                for j in range(MAX_TAPS):
                    for kk in range(ksz):
                        cm[kk * dil, j * LANE + g] = cw[c, kk]
                scale_row[g] = gsc[c]
                pbias_row[g] = gsc[c] * cb[0, c] + be[0, c]
                g += 1
    assert g == HIDR

    wq_w, wq_b, wk_w, wk_b = next(it), next(it), next(it), next(it)
    tenc_w, tenc_b, senc_w, senc_b = next(it), next(it), next(it), next(it)
    d_gate = next(it)
    gl1_w, gl1_b, gl2_w, gl2_b = next(it), next(it), next(it), next(it)
    gnn_w0, gnn_b0, gnn_w1, gnn_b1 = next(it), next(it), next(it), next(it)
    outw_node, outw_feat, out_b = next(it), next(it), next(it)
    hw_w, hw_b = next(it), next(it)

    # highway Linear(HW, 1) folded into the conv matrix (lane Z_LANE, tap block 0)
    for kk in range(HW):
        cm[W - HW + kk, Z_LANE] = hw_w[0, kk]

    ws = np.zeros((LANE, WSL_COLS), np.float32)
    ws[:HIDR, C_WQ:C_WQ + HIDA] = wq_w
    ws[:HIDR, C_WK:C_WK + HIDA] = wk_w
    ws[:HIDR, C_GL1:C_GL1 + HIDR] = gl1_w
    ws[:HIDR, C_GL2:C_GL2 + HIDR] = gl2_w
    ws[:HIDR, C_GNN0:C_GNN0 + HIDR] = gnn_w0
    ws[:HIDR, C_GNN1:C_GNN1 + HIDR] = gnn_w1

    adj_np = np.asarray(adj, np.float32)
    deg = np.asarray(degree, np.float32).reshape(M, 1)

    # spatial adjacency sigmoid(d_gate * d d^T) * adj, block-diagonal over batch
    d_outer = deg @ deg.T
    spatial = (1.0 / (1.0 + np.exp(-(d_gate * d_outer)))) * adj_np
    spatial_bd = np.kron(np.eye(B, dtype=np.float32), spatial)
    blkmask = np.kron(np.eye(B, dtype=np.float32), np.ones((M, M), np.float32))

    # s_enc = Linear(1, HIDR)(degree): identical for every batch element
    senc = np.zeros((BM, LANE), np.float32)
    senc[:, :HIDR] = np.tile(deg @ senc_w + senc_b, (B, 1))

    projb = np.zeros((LANE,), np.float32)
    projb[C_WQ:C_WQ + HIDA] = wq_b[0]
    projb[C_WK:C_WK + HIDA] = wk_b[0]
    projb[C_GL1:C_GL1 + HIDR] = gl1_b[0]
    projb[C_GL2:C_GL2 + HIDR] = gl2_b[0]

    slab = np.zeros((SLAB_ROWS, SLAB_COLS), np.float32)
    slab[R_CONV:R_CONV + W, :] = cm
    slab[R_WSL:R_WSL + LANE, :WSL_COLS] = ws
    slab[R_SPAT:R_SPAT + BM, :BM] = spatial_bd
    slab[R_BLK:R_BLK + BM, :BM] = blkmask
    slab[R_SENC:R_SENC + BM, :LANE] = senc
    slab[R_MISC + MS_SCALE, :LANE] = scale_row
    slab[R_MISC + MS_PBIAS, :LANE] = pbias_row
    slab[R_MISC + MS_PROJB, :LANE] = projb
    slab[R_MISC + MS_TENCW, :HIDR] = tenc_w[0]
    slab[R_MISC + MS_TENCB, :HIDR] = tenc_b[0]
    slab[R_MISC + MS_GNNB0, :HIDR] = gnn_b0[0]
    slab[R_MISC + MS_GNNB1, :HIDR] = gnn_b1[0]
    slab[R_MISC + MS_OUTN, :HIDR] = outw_node[0]
    slab[R_MISC + MS_OUTF, :HIDR] = outw_feat[0]
    slab[R_MISC + MS_SCAL, 0] = out_b[0, 0] + hw_b[0, 0]
    return jnp.asarray(slab)


@jax.jit
def epignn_forward(x, param_slab):
    """Per-call work: just the x layout transform + one pallas_call."""
    xb = jnp.transpose(x, (0, 2, 1)).reshape(BM, W)   # rows = (batch, region)
    res = pl.pallas_call(
        epignn_kernel,
        out_shape=jax.ShapeDtypeStruct((BM, 1), jnp.float32),
        in_specs=[pl.BlockSpec(memory_space=pltpu.MemorySpace.VMEM),
                  pl.BlockSpec(memory_space=pltpu.MemorySpace.VMEM)],
        out_specs=pl.BlockSpec(memory_space=pltpu.MemorySpace.VMEM),
    )(xb, param_slab)
    return res.reshape(B, M)


def make_params(key):
    keys = iter(jax.random.split(key, 64))

    def xavier(shape):
        fan_in, fan_out = shape[-2], shape[-1]
        lim = math.sqrt(6.0 / (fan_in + fan_out))
        return jax.random.uniform(next(keys), shape, _F32, -lim, lim)

    def unif(shape, n):
        s = 1.0 / math.sqrt(n)
        return jax.random.uniform(next(keys), shape, _F32, -s, s)

    params = []
    # RegionAwareConv branches: conv weight (K, ksz), conv bias, BN gamma, BN beta
    for (ksz, _dil, _pool) in BRANCHES:
        params += [xavier((K, ksz)), unif((1, K), K), unif((1, K), K), unif((1, K), K)]
    # WQ / WK
    params += [xavier((HIDR, HIDA)), unif((1, HIDA), HIDA),
               xavier((HIDR, HIDA)), unif((1, HIDA), HIDA)]
    # t_enc / s_enc (Linear(1, HIDR))
    params += [xavier((1, HIDR)), unif((1, HIDR), HIDR),
               xavier((1, HIDR)), unif((1, HIDR), HIDR)]
    # d_gate
    params += [xavier((M, M))]
    # GraphLearner linear1 / linear2
    params += [xavier((HIDR, HIDR)), unif((1, HIDR), HIDR),
               xavier((HIDR, HIDR)), unif((1, HIDR), HIDR)]
    # GraphConvLayer blocks (NLAYER = 2)
    params += [xavier((HIDR, HIDR)), unif((1, HIDR), HIDR),
               xavier((HIDR, HIDR)), unif((1, HIDR), HIDR)]
    # output Linear(2*HIDR, 1), split into node / feat_emb halves + bias
    params += [xavier((1, HIDR)), xavier((1, HIDR)), unif((1, 1), 2 * HIDR)]
    # highway Linear(HW, 1)
    params += [xavier((1, HW)), unif((1, 1), HW)]
    return params


if __name__ == "__main__":
    key = jax.random.PRNGKey(0)
    kx, kadj, kp = jax.random.split(key, 3)

    x = jax.random.normal(kx, (B, W, M), dtype=_F32)           # (batch, window, regions)
    adj = (jax.random.uniform(kadj, (M, M)) < 0.5).astype(_F32)
    adj = jnp.maximum(adj, jnp.eye(M, dtype=_F32))             # data.adj (self-loops)
    degree = jnp.sum(adj, axis=1)                              # data.degree_adj, (M,)

    params = make_params(kp)

    # one-time static packing; cached / reused across forward calls
    param_slab = build_param_slab(adj, degree, params)

    res = epignn_forward(x, param_slab)
    res = jax.block_until_ready(res)

    assert res.shape == (B, M), res.shape
    assert bool(jnp.all(jnp.isfinite(res)))
    print("KERNEL_OK")
</pallas_src>

<mosaic_0001>
module attributes {stable_mosaic.version = 11 : i64} {
  func.func @epignn_kernel(%arg0: memref<16x16xf32, #tpu.memory_space<vmem>>, %arg1: memref<208x896xf32, #tpu.memory_space<vmem>>, %arg2: memref<16x1xf32, #tpu.memory_space<vmem>>) attributes {dimension_semantics = [], scalar_prefetch = 0 : i64, scratch_operands = 0 : i64, tpu.core_type = #tpu.core_type<tc>} {
    %c0 = arith.constant 0 : index
    %c0_0 = arith.constant 0 : index
    %0 = vector.load %arg0[%c0, %c0_0] : memref<16x16xf32, #tpu.memory_space<vmem>>, vector<16x16xf32>
    %c0_1 = arith.constant 0 : index
    %c0_2 = arith.constant 0 : index
    %1 = vector.load %arg1[%c0_1, %c0_2] : memref<208x896xf32, #tpu.memory_space<vmem>>, vector<16x896xf32>
    %cst = arith.constant dense<0.000000e+00> : vector<16x896xf32>
    %2 = tpu.matmul %0, %1, %cst {dimension_numbers = #tpu.dot_dimension_numbers<[1], [0], [0], [1], [0, 0, 1, 1], [], []>} : vector<16x16xf32>, vector<16x896xf32>, vector<16x896xf32> -> vector<16x896xf32>
    %3 = vector.extract_strided_slice %2 {offsets = [0, 36], sizes = [16, 1], strides = [1, 1]} : vector<16x896xf32> to vector<16x1xf32>
    %4 = vector.extract_strided_slice %2 {offsets = [0, 0], sizes = [16, 128], strides = [1, 1]} : vector<16x896xf32> to vector<16x128xf32>
    %5 = vector.extract_strided_slice %2 {offsets = [0, 128], sizes = [16, 128], strides = [1, 1]} : vector<16x896xf32> to vector<16x128xf32>
    %6 = arith.maximumf %4, %5 : vector<16x128xf32>
    %7 = vector.extract_strided_slice %2 {offsets = [0, 256], sizes = [16, 128], strides = [1, 1]} : vector<16x896xf32> to vector<16x128xf32>
    %8 = arith.maximumf %6, %7 : vector<16x128xf32>
    %9 = vector.extract_strided_slice %2 {offsets = [0, 384], sizes = [16, 128], strides = [1, 1]} : vector<16x896xf32> to vector<16x128xf32>
    %10 = arith.maximumf %8, %9 : vector<16x128xf32>
    %11 = vector.extract_strided_slice %2 {offsets = [0, 512], sizes = [16, 128], strides = [1, 1]} : vector<16x896xf32> to vector<16x128xf32>
    %12 = arith.maximumf %10, %11 : vector<16x128xf32>
    %13 = vector.extract_strided_slice %2 {offsets = [0, 640], sizes = [16, 128], strides = [1, 1]} : vector<16x896xf32> to vector<16x128xf32>
    %14 = arith.maximumf %12, %13 : vector<16x128xf32>
    %15 = vector.extract_strided_slice %2 {offsets = [0, 768], sizes = [16, 128], strides = [1, 1]} : vector<16x896xf32> to vector<16x128xf32>
    %16 = arith.maximumf %14, %15 : vector<16x128xf32>
    %c192 = arith.constant 192 : index
    %c0_3 = arith.constant 0 : index
    %17 = vector.load %arg1[%c192, %c0_3] : memref<208x896xf32, #tpu.memory_space<vmem>>, vector<16x128xf32>
    %18 = vector.extract_strided_slice %17 {offsets = [0, 0], sizes = [1, 128], strides = [1, 1]} : vector<16x128xf32> to vector<1x128xf32>
    %19 = vector.broadcast %18 : vector<1x128xf32> to vector<16x128xf32>
    %20 = arith.mulf %16, %19 : vector<16x128xf32>
    %21 = vector.extract_strided_slice %17 {offsets = [1, 0], sizes = [1, 128], strides = [1, 1]} : vector<16x128xf32> to vector<1x128xf32>
    %22 = vector.broadcast %21 : vector<1x128xf32> to vector<16x128xf32>
    %23 = arith.addf %20, %22 : vector<16x128xf32>
    %24 = math.tanh %23 : vector<16x128xf32>
    %c16 = arith.constant 16 : index
    %c0_4 = arith.constant 0 : index
    %25 = vector.load %arg1[%c16, %c0_4] : memref<208x896xf32, #tpu.memory_space<vmem>>, vector<128x128xf32>
    %cst_5 = arith.constant dense<0.000000e+00> : vector<16x128xf32>
    %26 = tpu.matmul %24, %25, %cst_5 {dimension_numbers = #tpu.dot_dimension_numbers<[1], [0], [0], [1], [0, 0, 1, 1], [], []>} : vector<16x128xf32>, vector<128x128xf32>, vector<16x128xf32> -> vector<16x128xf32>
    %27 = vector.extract_strided_slice %17 {offsets = [2, 0], sizes = [1, 128], strides = [1, 1]} : vector<16x128xf32> to vector<1x128xf32>
    %28 = vector.broadcast %27 : vector<1x128xf32> to vector<16x128xf32>
    %29 = arith.addf %26, %28 : vector<16x128xf32>
    %30 = vector.extract_strided_slice %29 {offsets = [0, 0], sizes = [16, 16], strides = [1, 1]} : vector<16x128xf32> to vector<16x16xf32>
    %31 = vector.extract_strided_slice %29 {offsets = [0, 16], sizes = [16, 16], strides = [1, 1]} : vector<16x128xf32> to vector<16x16xf32>
    %32 = vector.extract_strided_slice %29 {offsets = [0, 32], sizes = [16, 36], strides = [1, 1]} : vector<16x128xf32> to vector<16x36xf32>
    %33 = math.tanh %32 : vector<16x36xf32>
    %34 = vector.extract_strided_slice %29 {offsets = [0, 68], sizes = [16, 36], strides = [1, 1]} : vector<16x128xf32> to vector<16x36xf32>
    %35 = math.tanh %34 : vector<16x36xf32>
    %c160 = arith.constant 160 : index
    %c0_6 = arith.constant 0 : index
    %36 = vector.load %arg1[%c160, %c0_6] : memref<208x896xf32, #tpu.memory_space<vmem>>, vector<16x16xf32>
    %cst_7 = arith.constant dense<0.000000e+00> : vector<16x16xf32>
    %37 = tpu.matmul %30, %31, %cst_7 {dimension_numbers = #tpu.dot_dimension_numbers<[1], [1], [0], [0], [0, 0, 1, 0], [], []>} : vector<16x16xf32>, vector<16x16xf32>, vector<16x16xf32> -> vector<16x16xf32>
    %38 = arith.mulf %37, %36 : vector<16x16xf32>
    %39 = arith.mulf %38, %38 : vector<16x16xf32>
    %cst_8 = arith.constant dense<0.000000e+00> : vector<16xf32>
    %40 = vector.multi_reduction <add>, %39, %cst_8 [1] : vector<16x16xf32> to vector<16xf32>
    %41 = vector.shape_cast %40 : vector<16xf32> to vector<16x1xf32>
    %cst_9 = arith.constant 1.000000e-24 : f32
    %42 = vector.broadcast %cst_9 : f32 to vector<16x1xf32>
    %43 = arith.maximumf %41, %42 : vector<16x1xf32>
    %44 = math.rsqrt %43 : vector<16x1xf32>
    %45 = vector.broadcast %44 : vector<16x1xf32> to vector<16x16xf32>
    %46 = arith.mulf %38, %45 : vector<16x16xf32>
    %cst_10 = arith.constant dense<0.000000e+00> : vector<16xf32>
    %47 = vector.multi_reduction <add>, %46, %cst_10 [1] : vector<16x16xf32> to vector<16xf32>
    %48 = vector.shape_cast %47 : vector<16xf32> to vector<16x1xf32>
    %49 = vector.extract_strided_slice %17 {offsets = [3, 0], sizes = [1, 128], strides = [1, 1]} : vector<16x128xf32> to vector<1x128xf32>
    %50 = vector.broadcast %48 : vector<16x1xf32> to vector<16x128xf32>
    %51 = vector.broadcast %49 : vector<1x128xf32> to vector<16x128xf32>
    %52 = arith.mulf %50, %51 : vector<16x128xf32>
    %53 = vector.extract_strided_slice %17 {offsets = [4, 0], sizes = [1, 128], strides = [1, 1]} : vector<16x128xf32> to vector<1x128xf32>
    %54 = vector.broadcast %53 : vector<1x128xf32> to vector<16x128xf32>
    %55 = arith.addf %52, %54 : vector<16x128xf32>
    %56 = arith.addf %24, %55 : vector<16x128xf32>
    %c176 = arith.constant 176 : index
    %c0_11 = arith.constant 0 : index
    %57 = vector.load %arg1[%c176, %c0_11] : memref<208x896xf32, #tpu.memory_space<vmem>>, vector<16x128xf32>
    %58 = arith.addf %56, %57 : vector<16x128xf32>
    %cst_12 = arith.constant dense<0.000000e+00> : vector<16x16xf32>
    %59 = tpu.matmul %33, %35, %cst_12 {dimension_numbers = #tpu.dot_dimension_numbers<[1], [1], [0], [0], [0, 0, 1, 0], [], []>} : vector<16x36xf32>, vector<16x36xf32>, vector<16x16xf32> -> vector<16x16xf32>
    %60 = tpu.transpose %59, [1, 0] : vector<16x16xf32> -> vector<16x16xf32>
    %61 = arith.subf %59, %60 : vector<16x16xf32>
    %62 = math.tanh %61 : vector<16x16xf32>
    %cst_13 = arith.constant 0.000000e+00 : f32
    %63 = vector.broadcast %cst_13 : f32 to vector<16x16xf32>
    %64 = arith.maximumf %62, %63 : vector<16x16xf32>
    %65 = arith.mulf %64, %36 : vector<16x16xf32>
    %c144 = arith.constant 144 : index
    %c0_14 = arith.constant 0 : index
    %66 = vector.load %arg1[%c144, %c0_14] : memref<208x896xf32, #tpu.memory_space<vmem>>, vector<16x16xf32>
    %67 = arith.addf %65, %66 : vector<16x16xf32>
    %cst_15 = arith.constant 0.000000e+00 : f32
    %68 = vector.broadcast %cst_15 : f32 to vector<16x16xf32>
    %69 = arith.cmpf ogt, %67, %68 : vector<16x16xf32>
    %cst_16 = arith.constant 1.000000e+00 : f32
    %70 = vector.broadcast %cst_16 : f32 to vector<16x16xf32>
    %71 = arith.select %69, %70, %67 : vector<16x16xi1>, vector<16x16xf32>
    %cst_17 = arith.constant dense<0.000000e+00> : vector<16xf32>
    %72 = vector.multi_reduction <add>, %71, %cst_17 [1] : vector<16x16xf32> to vector<16xf32>
    %73 = vector.shape_cast %72 : vector<16xf32> to vector<16x1xf32>
    %cst_18 = arith.constant 9.99999996E-13 : f32
    %74 = vector.broadcast %cst_18 : f32 to vector<16x1xf32>
    %75 = arith.addf %73, %74 : vector<16x1xf32>
    %76 = tpu.reciprocal %75 {approx = true} : vector<16x1xf32> -> vector<16x1xf32>
    %77 = vector.broadcast %76 : vector<16x1xf32> to vector<16x16xf32>
    %78 = arith.mulf %77, %71 : vector<16x16xf32>
    %c16_19 = arith.constant 16 : index
    %c128 = arith.constant 128 : index
    %79 = vector.load %arg1[%c16_19, %c128] : memref<208x896xf32, #tpu.memory_space<vmem>>, vector<128x128xf32>
    %cst_20 = arith.constant dense<0.000000e+00> : vector<16x128xf32>
    %80 = tpu.matmul %58, %79, %cst_20 {dimension_numbers = #tpu.dot_dimension_numbers<[1], [0], [0], [1], [0, 0, 1, 1], [], []>} : vector<16x128xf32>, vector<128x128xf32>, vector<16x128xf32> -> vector<16x128xf32>
    %cst_21 = arith.constant dense<0.000000e+00> : vector<16x128xf32>
    %81 = tpu.matmul %78, %80, %cst_21 {dimension_numbers = #tpu.dot_dimension_numbers<[1], [0], [0], [1], [0, 0, 1, 1], [], []>} : vector<16x16xf32>, vector<16x128xf32>, vector<16x128xf32> -> vector<16x128xf32>
    %82 = vector.extract_strided_slice %17 {offsets = [5, 0], sizes = [1, 128], strides = [1, 1]} : vector<16x128xf32> to vector<1x128xf32>
    %83 = vector.broadcast %82 : vector<1x128xf32> to vector<16x128xf32>
    %84 = arith.addf %81, %83 : vector<16x128xf32>
    %cst_22 = arith.constant 0.000000e+00 : f32
    %85 = vector.broadcast %cst_22 : f32 to vector<16x128xf32>
    %86 = arith.cmpf ogt, %84, %85 : vector<16x128xf32>
    %cst_23 = arith.constant 0.000000e+00 : f32
    %87 = vector.broadcast %cst_23 : f32 to vector<16x128xf32>
    %88 = arith.minimumf %84, %87 : vector<16x128xf32>
    %89 = math.exp %88 : vector<16x128xf32>
    %cst_24 = arith.constant 1.000000e+00 : f32
    %90 = vector.broadcast %cst_24 : f32 to vector<16x128xf32>
    %91 = arith.subf %89, %90 : vector<16x128xf32>
    %92 = arith.select %86, %84, %91 : vector<16x128xi1>, vector<16x128xf32>
    %c16_25 = arith.constant 16 : index
    %c256 = arith.constant 256 : index
    %93 = vector.load %arg1[%c16_25, %c256] : memref<208x896xf32, #tpu.memory_space<vmem>>, vector<128x128xf32>
    %cst_26 = arith.constant dense<0.000000e+00> : vector<16x128xf32>
    %94 = tpu.matmul %92, %93, %cst_26 {dimension_numbers = #tpu.dot_dimension_numbers<[1], [0], [0], [1], [0, 0, 1, 1], [], []>} : vector<16x128xf32>, vector<128x128xf32>, vector<16x128xf32> -> vector<16x128xf32>
    %cst_27 = arith.constant dense<0.000000e+00> : vector<16x128xf32>
    %95 = tpu.matmul %78, %94, %cst_27 {dimension_numbers = #tpu.dot_dimension_numbers<[1], [0], [0], [1], [0, 0, 1, 1], [], []>} : vector<16x16xf32>, vector<16x128xf32>, vector<16x128xf32> -> vector<16x128xf32>
    %96 = vector.extract_strided_slice %17 {offsets = [6, 0], sizes = [1, 128], strides = [1, 1]} : vector<16x128xf32> to vector<1x128xf32>
    %97 = vector.broadcast %96 : vector<1x128xf32> to vector<16x128xf32>
    %98 = arith.addf %95, %97 : vector<16x128xf32>
    %cst_28 = arith.constant 0.000000e+00 : f32
    %99 = vector.broadcast %cst_28 : f32 to vector<16x128xf32>
    %100 = arith.cmpf ogt, %98, %99 : vector<16x128xf32>
    %cst_29 = arith.constant 0.000000e+00 : f32
    %101 = vector.broadcast %cst_29 : f32 to vector<16x128xf32>
    %102 = arith.minimumf %98, %101 : vector<16x128xf32>
    %103 = math.exp %102 : vector<16x128xf32>
    %cst_30 = arith.constant 1.000000e+00 : f32
    %104 = vector.broadcast %cst_30 : f32 to vector<16x128xf32>
    %105 = arith.subf %103, %104 : vector<16x128xf32>
    %106 = arith.select %100, %98, %105 : vector<16x128xi1>, vector<16x128xf32>
    %107 = vector.extract_strided_slice %17 {offsets = [7, 0], sizes = [1, 128], strides = [1, 1]} : vector<16x128xf32> to vector<1x128xf32>
    %108 = vector.broadcast %107 : vector<1x128xf32> to vector<16x128xf32>
    %109 = arith.mulf %106, %108 : vector<16x128xf32>
    %110 = vector.extract_strided_slice %17 {offsets = [8, 0], sizes = [1, 128], strides = [1, 1]} : vector<16x128xf32> to vector<1x128xf32>
    %111 = vector.broadcast %110 : vector<1x128xf32> to vector<16x128xf32>
    %112 = arith.mulf %58, %111 : vector<16x128xf32>
    %113 = arith.addf %109, %112 : vector<16x128xf32>
    %cst_31 = arith.constant dense<0.000000e+00> : vector<16xf32>
    %114 = vector.multi_reduction <add>, %113, %cst_31 [1] : vector<16x128xf32> to vector<16xf32>
    %115 = vector.shape_cast %114 : vector<16xf32> to vector<16x1xf32>
    %116 = arith.addf %115, %3 : vector<16x1xf32>
    %117 = vector.extract_strided_slice %17 {offsets = [9, 0], sizes = [1, 1], strides = [1, 1]} : vector<16x128xf32> to vector<1x1xf32>
    %118 = vector.broadcast %117 : vector<1x1xf32> to vector<16x1xf32>
    %119 = arith.addf %116, %118 : vector<16x1xf32>
    %c0_32 = arith.constant 0 : index
    %c0_33 = arith.constant 0 : index
    %120 = vector.load %arg2[%c0_32, %c0_33] : memref<16x1xf32, #tpu.memory_space<vmem>>, vector<16x1xf32>
    tpu.vector_store %arg2[%c0_32, %c0_33], %119 {strides = array<i32>} : memref<16x1xf32, #tpu.memory_space<vmem>>, vector<16x1xf32>,
    return
  }
}

</mosaic_0001>

<bundles_post_ra>
// kernel: epignn_forward.1
= control target key start
LH: loop header
LB: loop body
LE: loop exit
PB: predicated region body
PF: predicated region fallthrough
CT: control target
= control target key end

     0   :  { %7 = vsyncpa [#allocation3], 0  ;;  %s1652_s0 = inlined_call_operand.hbm [shape: f32[16,16], index: 0, kind: input, shape index: {}]   ;;  %s1653_s1 = inlined_call_operand.hbm [shape: f32[208,896], index: 1, kind: input, shape index: {}]   ;;  %s1654_s2 = inlined_call_operand.vmem [shape: f32[16,1], index: 2, kind: output, shape index: {}]  }
   0x1   :  { %8 = vsyncpa [#allocation5], 0  ;;  %s1517_s9 = smov [#allocation2]  }
   0x2   :  { %s14_s10 = sshll.u32 %s1517_s9, 4  ;;  %s15_s10 = int_to_ptr.vmem [resolvable:$true] %s14_s10 }
   0x3   :  { %s1481_s11 = scalar_lea.vmem %s15_s10, 256  ;;  %p1486_p1 = scmp.lt.s32.totalorder %s15_s10, %s15_s10 }
   0x4   :  { %p1482_p0 = scmp.ne.s32.totalorder %s15_s10, %s1481_s11  ;;  %p1487_p2 = scmp.lt.s32.totalorder %s1481_s11, %s1481_s11 }
   0x6   :  { %p1488_p3 = por %p1487_p2, %p1486_p1 }
   0x8   :  { %p1489_p4 = pnand %p1488_p3, %p1482_p0 }
   0xa   :  { %1492 = shalt.err (!%p1489_p4)
}
   0xb   :  { %s1518_s12 = smov 128   ;;  %s1519_s13 = smov 8  }
   0xc   :  { %20 = dma.hbm_to_vmem [thread:$0]  %s1652_s0, 256, %s15_s10, [#allocation3], %s1518_s12, %s1518_s12, %s1519_s13  }
   0xd   :  { %s1520_s16 = smov [#allocation4]  }
   0xe   :  { %s26_s17 = sshll.u32 %s1520_s16, 4  ;;  %s27_s17 = int_to_ptr.vmem [resolvable:$true] %s26_s17 }
   0xf   :  { %s1501_s18 = scalar_lea.vmem %s27_s17, 23296  ;;  %p1506_p6 = scmp.lt.s32.totalorder %s27_s17, %s27_s17 }
  0x10   :  { %p1502_p5 = scmp.ne.s32.totalorder %s27_s17, %s1501_s18  ;;  %p1507_p7 = scmp.lt.s32.totalorder %s1501_s18, %s1501_s18 }
  0x12   :  { %p1508_p8 = por %p1507_p7, %p1506_p6 }
  0x14   :  { %p1509_p9 = pnand %p1508_p8, %p1502_p5 }
  0x16   :  { %1512 = shalt.err (!%p1509_p9)
}
  0x17   :  { %s1521_s19 = smov 896   ;;  %s1522_s20 = smov 56  }
  0x18   :  { %32 = dma.hbm_to_vmem [thread:$0]  %s1653_s1, 23296, %s27_s17, [#allocation5], %s1521_s19, %s1521_s19, %s1522_s20  }
  0x19   :  { %1513 = dma.done.wait [#allocation3], 256  }
  0x1a   :  { %1514 = vsyncadd [#allocation3], 4294967040 }
  0x1b   :  { %1515 = dma.done.wait [#allocation5], 23296  }
  0x1c   :  { %1516 = vsyncadd [#allocation5], 4294944000  ;;  %v1523_v0 = vmov 0.0   ;;  %v49_v1 = vld [vmem:[#allocation4 + $0x40] sm:$0xff]  ;;  %v48_v2 = vld [vmem:[#allocation4 + $0x38] sm:$0xff]  ;;  %vm55_vm0 = vcmask 130048   ;;  %v382_v36 = vlaneseq }
  0x1d   :  { %126 = vmatprep.mubr.f32.mxu1 %v1523_v0  ;;  %280 = vmatprep.mubr.f32.mxu0 %v1523_v0  ;;  %v42_v3 = vld [vmem:[#allocation4 + $0x8] sm:$0xff]  ;;  %v41_v4 = vld [vmem:[#allocation4] sm:$0xff]  ;;  %v39_v5 = vld [vmem:[#allocation2] sm:$0xff]  ;;  %s1524_s0 = smov 112   ;;  %s1525_s1 = smov 60   ;;  %vm634_vm1 = vcmask 293888  }
  0x1e   :  { %90 = vmatprep.subr.mxu1 %v49_v1  ;;  %v51_v6 = vld [vmem:[#allocation4 + $0x50] sm:$0xff]  ;;  %v50_v7 = vld [vmem:[#allocation4 + $0x48] sm:$0xff]  ;;  %v53_v8 = vld [vmem:[#allocation4 + $0x60] sm:$0xff]  ;;  %v1563_v42 = vshrl.u32 %v382_v36, 7  ;;  %s1526_s23 = smov 96   ;;  %s1527_s24 = smov 36  }
  0x1f   :  { %91 = vmatpush1.msra.mxu1 %v48_v2  ;;  %v44_v9 = vld [vmem:[#allocation4 + $0x18] sm:$0xff]  ;;  %244 = vmatprep.subr.mxu0 %v53_v8  ;;  %v43_v11 = vld [vmem:[#allocation4 + $0x10] sm:$0xff]  ;;  %v46_v12 = vld [vmem:[#allocation4 + $0x28] sm:$0xff]  ;;  %s1528_s25 = smov 92   ;;  %vm1186_vm8 = vcmask 7168  }
  0x20   :  { %92 = vmatprep.subr.mxu1 %v42_v3  ;;  %v52_v10 = vld [vmem:[#allocation4 + $0x58] sm:$0xff]  ;;  %v45_v14 = vld [vmem:[#allocation4 + $0x20] sm:$0xff]  ;;  %v54_v15 = vld [vmem:[#allocation4 + $0x68] sm:$0xff]  ;;  %v384_v50 = vsub.s32 0, %v1563_v42  ;;  %v390_v55 = vsub.s32 1, %v1563_v42  ;;  %v414_v8 = vsub.s32 2, %v1563_v42 }
  0x21   :  { %93 = vmatpush1.msra.mxu1 %v41_v4  ;;  %v40_v13 = vld [vmem:[#allocation2 + $0x8] sm:$0xff]  ;;  %245 = vmatpush1.msra.mxu0 %v52_v10  ;;  %v47_v16 = vld [vmem:[#allocation4 + $0x30] sm:$0xff]  ;;  %v410_v18 = vld [vmem:[#allocation4 + $0x380] sm:$0xff] }
  0x22   :  { %1195 = vmatmul.mubr.msk.f32.vlgmr.msra.gmra.mxu1 %vm55_vm0, %v39_v5  ;;  %167 = vmatprep.subr.mxu1 %v51_v6  ;;  %v411_v17 = vld [vmem:[#allocation4 + $0x3b8] sm:$0xff]  ;;  %v409_v19 = vld [vmem:[#allocation4 + $0x348] sm:$0xff]  ;;  %v408_v20 = vld [vmem:[#allocation4 + $0x310] sm:$0xff] }
  0x23   :  { %168 = vmatpush1.msra.mxu1 %v50_v7  ;;  %132 = vmatprep.mubr.f32.mxu1 %v1523_v0  ;;  %v407_v21 = vld [vmem:[#allocation4 + $0x2d8] sm:$0xff]  ;;  %v406_v22 = vld [vmem:[#allocation4 + $0x2a0] sm:$0xff]  ;;  %v405_v23 = vld [vmem:[#allocation4 + $0x268] sm:$0xff] }
  0x24   :  { %169 = vmatprep.subr.mxu1 %v44_v9  ;;  %246 = vmatprep.subr.mxu0 %v46_v12  ;;  %v404_v24 = vld [vmem:[#allocation4 + $0x230] sm:$0xff]  ;;  %v403_v25 = vld [vmem:[#allocation4 + $0x1f8] sm:$0xff]  ;;  %v402_v26 = vld [vmem:[#allocation4 + $0x1c0] sm:$0xff] }
  0x25   :  { %170 = vmatpush1.msra.mxu1 %v43_v11  ;;  %247 = vmatpush1.msra.mxu0 %v45_v14  ;;  %v401_v27 = vld [vmem:[#allocation4 + $0x188] sm:$0xff]  ;;  %v400_v28 = vld [vmem:[#allocation4 + $0x150] sm:$0xff]  ;;  %v399_v29 = vld [vmem:[#allocation4 + $0x118] sm:$0xff] }
  0x26   :  { %1196 = vmatmul.mubr.msk.f32.gmra.mxu1 %vm55_vm0, %v40_v13  ;;  %1293 = vmatprep.subr.mxu1 %v54_v15  ;;  %v398_v30 = vld [vmem:[#allocation4 + $0xe0] sm:$0xff]  ;;  %v397_v31 = vld [vmem:[#allocation4 + $0xa8] sm:$0xff]  ;;  %v396_v32 = vld [vmem:[#allocation4 + $0x70] sm:$0xff] }
  0x27   :  { %203 = vmatprep.mubr.f32.mxu1 %v1523_v0  ;;  %1199 = vmatmul.mubr.msk.f32.vlgmr.msra.gmra.mxu0 %vm55_vm0, %v39_v5  ;;  %v1567_v53 = vld [vmem:[#allocation4 + $0x540] sm:$0xff] }
  0x28   :  { %286 = vmatprep.mubr.f32.mxu0 %v1523_v0  ;;  %1300 = vmatprep.subr.mxu0 %v411_v17  ;;  %v385_v59 = vrot.slane %v1567_v53, %v384_v50  ;;  %v391_v63 = vrot.slane %v1567_v53, %v390_v55  ;;  %v415_v9 = vrot.slane %v1567_v53, %v414_v8  ;;  %v793_v36 = vld [vmem:[#allocation4 + $0x3c0] sm:$0xff] }
  0x29   :  { %1301 = vmatpush3.msra.mxu0 %v411_v17 }
  0x2a   :  { %1197 = vmatmul.mubr.msk.f32.vlgmr.msra.gmra.mxu1 %vm55_vm0, %v39_v5  ;;  %1302 = vmatprep.subr.mxu0 %v410_v18 }
  0x2b   :  { %1294 = vmatpush3.msra.mxu1 %v54_v15  ;;  %209 = vmatprep.mubr.f32.mxu1 %v1523_v0 }
  0x2c   :  { %1295 = vmatprep.subr.mxu1 %v47_v16  ;;  %1200 = vmatmul.mubr.msk.f32.gmra.mxu0 %vm55_vm0, %v40_v13 }
  0x2d   :  { %1296 = vmatpush3.msra.mxu1 %v47_v16  ;;  %1303 = vmatpush3.msra.mxu0 %v410_v18 }
  0x2e   :  { %1198 = vmatmul.mubr.msk.f32.gmra.mxu1 %vm55_vm0, %v40_v13  ;;  %1304 = vmatprep.subr.mxu0 %v409_v19 }
  0x2f   :  { %1297 = vmatprep.mubr.msk.f32.mxu1 %vm55_vm0, %v39_v5  ;;  %1305 = vmatpush3.msra.mxu0 %v409_v19 }
  0x30   :  { %1306 = vmatprep.subr.mxu0 %v408_v20 }
  0x31   :  { %1307 = vmatpush3.msra.mxu0 %v408_v20 }
  0x32   :  { %1298 = vmatmul.mubr.msk.f32.vlgmr.msra.gmra.mxu1 %vm55_vm0, %v40_v13  ;;  %1308 = vmatprep.subr.mxu0 %v407_v21 }
  0x33   :  { %1309 = vmatpush3.msra.mxu0 %v407_v21 }
  0x34   :  { %1310 = vmatprep.subr.mxu0 %v406_v22 }
  0x35   :  { %1311 = vmatpush3.msra.mxu0 %v406_v22  ;;  %v1590_v22 = vld [vmem:[#allocation4 + $0x498] sm:$0xff] }
  0x36   :  { %1312 = vmatprep.subr.mxu0 %v405_v23 }
  0x37   :  { %1313 = vmatpush3.msra.mxu0 %v405_v23 }
  0x38   :  { %1314 = vmatprep.subr.mxu0 %v404_v24 }
  0x39   :  { %1315 = vmatpush3.msra.mxu0 %v404_v24  ;;  %v1592_v24 = vld [vmem:[#allocation4 + $0x460] sm:$0xff] }
  0x3a   :  { %1316 = vmatprep.subr.mxu0 %v403_v25 }
  0x3b   :  { %1317 = vmatpush3.msra.mxu0 %v403_v25 }
  0x3c   :  { %1318 = vmatprep.subr.mxu0 %v402_v26 }
  0x3d   :  { %1319 = vmatpush3.msra.mxu0 %v402_v26 }
  0x3e   :  { %1320 = vmatprep.subr.mxu0 %v401_v27 }
  0x3f   :  { %1321 = vmatpush3.msra.mxu0 %v401_v27 }
  0x40   :  { %1322 = vmatprep.subr.mxu0 %v400_v28 }
  0x41   :  { %1323 = vmatpush3.msra.mxu0 %v400_v28 }
  0x42   :  { %1324 = vmatprep.subr.mxu0 %v399_v29 }
  0x43   :  { %1325 = vmatpush3.msra.mxu0 %v399_v29 }
  0x44   :  { %1326 = vmatprep.subr.mxu0 %v398_v30 }
  0x45   :  { %1327 = vmatpush3.msra.mxu0 %v398_v30 }
  0x46   :  { %1328 = vmatprep.subr.mxu0 %v397_v31 }
  0x47   :  { %1329 = vmatpush3.msra.mxu0 %v397_v31 }
  0x48   :  { %1330 = vmatprep.subr.mxu0 %v396_v32 }
  0x49   :  { %1331 = vmatpush3.msra.mxu0 %v396_v32 }
  0xe2   :  { %v1558_v33 = vpop.f32.mrf.mxu1 }
  0xe4   :  { %v130_v34 = vpop.f32.mrf.mxu1 }
  0xe5   :  { %v368_v39 = vmax.f32 %v1558_v33, %v130_v34 }
  0xe6   :  { %v1560_v35 = vpop.f32.mrf.mxu1 }
  0xe7   :  { %v282_v38 = vpop.f32.mrf.mxu0 }
  0xe8   :  { %v136_v37 = vpop.f32.mrf.mxu1 }
  0xe9   :  { %v284_v44 = vpop.f32.mrf.mxu0  ;;  %v369_v45 = vmax.f32 %v1560_v35, %v136_v37  ;;  %v792_v37 = vld [vmem:[#allocation4 + $0x388] sm:$0xff] }
  0xea   :  { %v205_v40 = vpop.f32.mrf.mxu1 }
  0xeb   :  { %v370_v41 = vmax.f32 %v368_v39, %v205_v40  ;;  %v790_v39 = vld [vmem:[#allocation4 + $0x318] sm:$0xff]  ;;  %v789_v40 = vld [vmem:[#allocation4 + $0x2e0] sm:$0xff] }
  0xec   :  { %v207_v43 = vpop.f32.mrf.mxu1  ;;  %v288_v52 = vpop.f32.mrf.mxu0 }
  0xed   :  { %v372_v46 = vmax.f32 %v370_v41, %v207_v43  ;;  %v788_v41 = vld [vmem:[#allocation4 + $0x2a8] sm:$0xff]  ;;  %v787_v43 = vld [vmem:[#allocation4 + $0x270] sm:$0xff] }
  0xee   :  { %v211_v47 = vpop.f32.mrf.mxu1  ;;  %v290_v60 = vpop.f32.mrf.mxu0 }
  0xef   :  { %v374_v48 = vmax.f32 %v372_v46, %v282_v38  ;;  %v371_v49 = vmax.f32 %v369_v45, %v211_v47  ;;  %v791_v38 = vld [vmem:[#allocation4 + $0x350] sm:$0xff]  ;;  %v785_v45 = vld [vmem:[#allocation4 + $0x200] sm:$0xff]  ;;  %v784_v46 = vld [vmem:[#allocation4 + $0x1c8] sm:$0xff] }
  0xf0   :  { %v213_v51 = vpop.f32.mrf.mxu1 }
  0xf1   :  { %v373_v54 = vmax.f32 %v371_v49, %v213_v51  ;;  %v376_v57 = vmax.f32 %v374_v48, %v284_v44  ;;  %v786_v44 = vld [vmem:[#allocation4 + $0x238] sm:$0xff] }
  0xf2   :  { %v1299_v56 = vpop.f32.mrf.mxu1 }
  0xf3   :  { %v375_v58 = vmax.f32 %v373_v54, %v288_v52 }
  0xf4   :  { %v359_v61 = vpop.f32.mrf.mxu1 }
  0xf5   :  { %v377_v62 = vmax.f32 %v375_v58, %v290_v60  ;;  %v378_v0 = vmax.f32 %v376_v57, %v359_v61  ;;  %v783_v60 = vld [vmem:[#allocation4 + $0x190] sm:$0xff]  ;;  %v782_v61 = vld [vmem:[#allocation4 + $0x158] sm:$0xff] }
  0xf7   :  { %v379_v1 = vmax.f32 %v377_v62, %v1299_v56  ;;  %v386_v2 = vmul.f32 %v385_v59, %v378_v0  ;;  %v781_v62 = vld [vmem:[#allocation4 + $0x120] sm:$0xff] }
  0xf9   :  { %v387_v3 = vmul.f32 %v385_v59, %v379_v1  ;;  %v392_v4 = vadd.f32 %v391_v63, %v386_v2  ;;  %v779_v2 = vld [vmem:[#allocation4 + $0xb0] sm:$0xff] }
  0xfb   :  { %v393_v5 = vadd.f32 %v391_v63, %v387_v3  ;;  %1445 = vtanh.f32 %v392_v4  ;;  %v780_v63 = vld [vmem:[#allocation4 + $0xe8] sm:$0xff]  ;;  %v778_v3 = vld [vmem:[#allocation4 + $0x78] sm:$0xff] }
  0xfd   :  { %1447 = vtanh.f32 %v393_v5 }
 0x108   :  { %v1576_v6 = vpop.eup %1445 }
 0x109   :  { %1332 = vmatprep.mubr.f32.mxu0 %v1576_v6 }
 0x10a   :  { %v1579_v7 = vpop.eup %1447 }
 0x10b   :  { %1333 = vmatmul.mubr.f32.vlgmr.msra.gmra.mxu0 %v1579_v7 }
 0x1cb   :  { %v1334_v10 = vpop.f32.mrf.mxu0 }
 0x1cc   :  { %v488_v11 = vadd.f32 %v1334_v10, %v415_v9  ;;  %v758_v10 = vld [vmem:[#allocation4 + $0x3f0] sm:$0xff] }
 0x1cd   :  { %v482_v12 = vpop.f32.mrf.mxu0 }
 0x1ce   :  { %1449 = vtanh.f32 %v488_v11  ;;  %v483_v13 = vadd.f32 %v482_v12, %v415_v9  ;;  %499 = vrot.lane.b32.xlu0 %v488_v11, %s1524_s0 }
 0x1d0   :  { %1451 = vtanh.f32 %v483_v13  ;;  %1339 = vmatprep.mubr.msk.f32.mxu1 %vm55_vm0, %v483_v13 }
 0x1d2   :  { %497 = vrot.lane.b32.xlu0 %v483_v13, %s1524_s0 }
 0x1db   :  { %v1450_v14 = vpop.eup %1449 }
 0x1dc   :  { %632 = vrot.lane.b32.xlu1 %v1450_v14, %s1525_s1 }
 0x1dd   :  { %v1452_v15 = vpop.eup %1451 }
 0x1de   :  { %626 = vrot.lane.b32.xlu0 %v1452_v15, %s1526_s23 }
 0x1e0   :  { %630 = vrot.lane.b32.xlu1 %v1452_v15, %s1525_s1  ;;  %v759_v15 = vld [vmem:[#allocation4 + $0x428] sm:$0xff] }
 0x1e4   :  { %628 = vrot.lane.b32.xlu1 %v1450_v14, %s1526_s23 }
 0x240   :  { %v500_v16 = vpop.permute.xlu0 %499 }
 0x241   :  { %1335 = vmatprep.subr.msk.mxu1 %vm55_vm0, %v500_v16 }
 0x242   :  { %1336 = vmatpush3.xpose.msk.msra.mxu1 %vm55_vm0, %v500_v16 }
 0x244   :  { %v498_v17 = vpop.permute.xlu0 %497 }
 0x245   :  { %1337 = vmatprep.subr.msk.mxu1 %vm55_vm0, %v498_v17 }
 0x246   :  { %1338 = vmatpush3.xpose.msk.msra.mxu1 %vm55_vm0, %v498_v17 }
 0x249   :  { %1340 = vmatmul.mubr.msk.f32.vlgmr.msra.gmra.mxu1 %vm55_vm0, %v488_v11 }
 0x24e   :  { %v633_v18 = vpop.permute.xlu1 %632 }
 0x24f   :  { %1342 = vmatprep.subr.msk.mxu1 %vm634_vm1, %v633_v18 }
 0x250   :  { %1343 = vmatpush3.xpose.msk.msra.mxu1 %vm634_vm1, %v633_v18  ;;  %v627_v19 = vpop.permute.xlu0 %626 }
 0x251   :  { %1346 = vmatprep.mubr.msk.f32.mxu1 %vm634_vm1, %v627_v19 }
 0x252   :  { %v631_v20 = vpop.permute.xlu1 %630 }
 0x253   :  { %1344 = vmatprep.subr.msk.mxu1 %vm634_vm1, %v631_v20 }
 0x254   :  { %1345 = vmatpush3.xpose.msk.msra.mxu1 %vm634_vm1, %v631_v20 }
 0x255   :  { %1349 = vmatprep.subr.mxu1 %v793_v36 }
 0x256   :  { %v629_v21 = vpop.permute.xlu1 %628 }
 0x257   :  { %1347 = vmatmul.mubr.msk.f32.vlgmr.msra.gmra.mxu1 %vm634_vm1, %v629_v21 }
 0x258   :  { %1350 = vmatpush3.msra.mxu1 %v793_v36 }
 0x259   :  { %1351 = vmatprep.subr.mxu1 %v792_v37 }
 0x25a   :  { %1352 = vmatpush3.msra.mxu1 %v792_v37  ;;  %v621_v37 = vld [vmem:[#allocation4 + $0x508] sm:$0xff] }
 0x25b   :  { %1353 = vmatprep.subr.mxu1 %v791_v38 }
 0x25c   :  { %1354 = vmatpush3.msra.mxu1 %v791_v38 }
 0x25d   :  { %1355 = vmatprep.subr.mxu1 %v790_v39 }
 0x25e   :  { %1356 = vmatpush3.msra.mxu1 %v790_v39 }
 0x25f   :  { %1357 = vmatprep.subr.mxu1 %v789_v40 }
 0x260   :  { %1358 = vmatpush3.msra.mxu1 %v789_v40 }
 0x261   :  { %1359 = vmatprep.subr.mxu1 %v788_v41 }
 0x262   :  { %1360 = vmatpush3.msra.mxu1 %v788_v41 }
 0x263   :  { %1361 = vmatprep.subr.mxu1 %v787_v43 }
 0x264   :  { %1362 = vmatpush3.msra.mxu1 %v787_v43 }
 0x265   :  { %1363 = vmatprep.subr.mxu1 %v786_v44 }
 0x266   :  { %1364 = vmatpush3.msra.mxu1 %v786_v44 }
 0x267   :  { %1365 = vmatprep.subr.mxu1 %v785_v45 }
 0x268   :  { %1366 = vmatpush3.msra.mxu1 %v785_v45 }
 0x269   :  { %1367 = vmatprep.subr.mxu1 %v784_v46 }
 0x26a   :  { %1368 = vmatpush3.msra.mxu1 %v784_v46 }
 0x26b   :  { %1369 = vmatprep.subr.mxu1 %v783_v60 }
 0x26c   :  { %1370 = vmatpush3.msra.mxu1 %v783_v60  ;;  %v973_v60 = vld [vmem:[#allocation4 + $0x208] sm:$0xff] }
 0x26d   :  { %1371 = vmatprep.subr.mxu1 %v782_v61 }
 0x26e   :  { %1372 = vmatpush3.msra.mxu1 %v782_v61  ;;  %v972_v61 = vld [vmem:[#allocation4 + $0x1d0] sm:$0xff] }
 0x26f   :  { %1373 = vmatprep.subr.mxu1 %v781_v62 }
 0x270   :  { %1374 = vmatpush3.msra.mxu1 %v781_v62  ;;  %v971_v62 = vld [vmem:[#allocation4 + $0x198] sm:$0xff] }
 0x271   :  { %1375 = vmatprep.subr.mxu1 %v780_v63 }
 0x272   :  { %1376 = vmatpush3.msra.mxu1 %v780_v63  ;;  %v970_v63 = vld [vmem:[#allocation4 + $0x160] sm:$0xff] }
 0x273   :  { %1377 = vmatprep.subr.mxu1 %v779_v2 }
 0x274   :  { %1378 = vmatpush3.msra.mxu1 %v779_v2  ;;  %v967_v2 = vld [vmem:[#allocation4 + $0xb8] sm:$0xff] }
 0x275   :  { %1379 = vmatprep.subr.mxu1 %v778_v3 }
 0x276   :  { %1380 = vmatpush3.msra.mxu1 %v778_v3  ;;  %v966_v3 = vld [vmem:[#allocation4 + $0x80] sm:$0xff] }
 0x309   :  { %v1341_v23 = vpop.f32.mrf.mxu1 }
 0x30a   :  { %v585_v25 = vmul.f32 %v1341_v23, %v1590_v22  ;;  %v608_v23 = vsub.s32 3, %v1563_v42 }
 0x30b   :  { %v575_v26 = vpop.f32.mrf.mxu1 }
 0x30c   :  { %v584_v27 = vmul.f32 %v575_v26, %v1592_v24  ;;  %v587_v28 = vmul.f32 %v585_v25, %v585_v25 }
 0x30e   :  { %v591_v29 = vsel %vm55_vm0, %v587_v28, 0.0  ;;  %v586_v30 = vmul.f32 %v584_v27, %v584_v27 }
 0x30f   :  { %592 = vadd.xlane.f32.xlu1 %v591_v29 }
 0x310   :  { %v588_v31 = vsel %vm55_vm0, %v586_v30, 0.0  ;;  %v620_v30 = vld [vmem:[#allocation4 + $0x4d0] sm:$0xff] }
 0x311   :  { %589 = vadd.xlane.f32.xlu0 %v588_v31 }
 0x317   :  { %v1598_v32 = vpop.f32.mrf.mxu1 }
 0x319   :  { %v1600_v34 = vpop.f32.mrf.mxu1 }
 0x342   :  { %718 = vxpose.xlu1.b32.start [1/2] (short) (narrow) %v1600_v34, 16 }
 0x346   :  { %719 = vxpose.xlu1.b32.end [2/2] (short) (narrow) %v1598_v32, 16 }
 0x398   :  { %v593_v47 = vpop.xlane.xlu1 %592 }
 0x399   :  { %v595_v48 = vmax.f32 %v593_v47, 1e-24 }
 0x39a   :  { %v590_v49 = vpop.xlane.xlu0 %589 }
 0x39b   :  { %v594_v51 = vmax.f32 %v590_v49, 1e-24  ;;  %1453 = vrsqrt.f32 %v595_v48  ;;  %v981_v48 = vld [vmem:[#allocation4 + $0x3c8] sm:$0xff] }
 0x39d   :  { %1455 = vrsqrt.f32 %v594_v51  ;;  %v980_v51 = vld [vmem:[#allocation4 + $0x390] sm:$0xff] }
 0x3a8   :  { %v1454_v52 = vpop.eup %1453 }
 0x3a9   :  { %v599_v58 = vmul.f32 %v1454_v52, %v585_v25  ;;  %v609_v25 = vrot.slane %v1567_v53, %v608_v23  ;;  %v979_v52 = vld [vmem:[#allocation4 + $0x358] sm:$0xff] }
 0x3aa   :  { %v1456_v54 = vpop.eup %1455 }
 0x3ab   :  { %v598_v56 = vmul.f32 %v1456_v54, %v584_v27  ;;  %v603_v59 = vsel %vm55_vm0, %v599_v58, 0.0  ;;  %v978_v54 = vld [vmem:[#allocation4 + $0x320] sm:$0xff]  ;;  %v975_v58 = vld [vmem:[#allocation4 + $0x278] sm:$0xff] }
 0x3ad   :  { %v600_v57 = vsel %vm55_vm0, %v598_v56, 0.0  ;;  %v977_v56 = vld [vmem:[#allocation4 + $0x2e8] sm:$0xff] }
 0x3ae   :  { %601 = vadd.xlane.f32.xlu0 %v600_v57  ;;  %v976_v57 = vld [vmem:[#allocation4 + $0x2b0] sm:$0xff] }
 0x3b2   :  { %604 = vadd.xlane.f32.xlu0 %v603_v59  ;;  %v974_v59 = vld [vmem:[#allocation4 + $0x240] sm:$0xff] }
 0x3be   :  { %v734_v0 = vpop.trf.xlu1 }
 0x3bf   :  { %v750_v1 = vsub.f32 %v1600_v34, %v734_v0  ;;  %v969_v0 = vld [vmem:[#allocation4 + $0x128] sm:$0xff] }
 0x3c1   :  { %1457 = vtanh.f32 %v750_v1  ;;  %v968_v1 = vld [vmem:[#allocation4 + $0xf0] sm:$0xff] }
 0x3c2   :  { %v735_v4 = vpop.trf.xlu1 }
 0x3c3   :  { %v751_v5 = vsub.f32 %v1598_v32, %v735_v4  ;;  %v871_v4 = vsub.s32 5, %v1563_v42 }
 0x3c5   :  { %1459 = vtanh.f32 %v751_v5  ;;  %v872_v5 = vrot.slane %v1567_v53, %v871_v4 }
 0x3ce   :  { %v1458_v8 = vpop.eup %1457 }
 0x3cf   :  { %v754_v9 = vmax.f32 %v1458_v8, 0.0 }
 0x3d1   :  { %v756_v11 = vmul.f32 %v754_v9, %v1592_v24  ;;  %v614_v24 = vsub.s32 4, %v1563_v42 }
 0x3d2   :  { %v1460_v12 = vpop.eup %1459 }
 0x3d3   :  { %v755_v13 = vmax.f32 %v1460_v12, 0.0  ;;  %v760_v14 = vadd.f32 %v758_v10, %v756_v11  ;;  %v615_v26 = vrot.slane %v1567_v53, %v614_v24 }
 0x3d5   :  { %vm762_vm2 = vcmp.gt.f32.partialorder %v760_v14, 0.0  ;;  %v757_v16 = vmul.f32 %v755_v13, %v1590_v22 }
 0x3d6   :  { %v764_v17 = vsel %vm762_vm2, 1.0, %v760_v14 }
 0x3d7   :  { %v766_v18 = vsel %vm55_vm0, %v764_v17, 0.0  ;;  %v761_v19 = vadd.f32 %v759_v15, %v757_v16 }
 0x3d8   :  { %767 = vadd.xlane.f32.xlu0 %v766_v18 }
 0x3d9   :  { %vm763_vm3 = vcmp.gt.f32.partialorder %v761_v19, 0.0 }
 0x3da   :  { %v765_v20 = vsel %vm763_vm3, 1.0, %v761_v19 }
 0x3db   :  { %v769_v21 = vsel %vm55_vm0, %v765_v20, 0.0 }
 0x3dc   :  { %770 = vadd.xlane.f32.xlu0 %v769_v21 }
 0x437   :  { %v602_v27 = vpop.xlane.xlu0 %601 }
 0x438   :  { %v610_v22 = vmul.f32 %v609_v25, %v602_v27 }
 0x43a   :  { %v616_v28 = vadd.f32 %v615_v26, %v610_v22 }
 0x43b   :  { %v605_v29 = vpop.xlane.xlu0 %604 }
 0x43c   :  { %v618_v31 = vadd.f32 %v1576_v6, %v616_v28  ;;  %v611_v32 = vmul.f32 %v609_v25, %v605_v29  ;;  %v1059_v25 = vsub.s32 6, %v1563_v42 }
 0x43e   :  { %v617_v34 = vadd.f32 %v615_v26, %v611_v32  ;;  %v1617_v36 = vadd.f32 %v620_v30, %v618_v31  ;;  %v1060_v26 = vrot.slane %v1567_v53, %v1059_v25 }
 0x440   :  { %v619_v38 = vadd.f32 %v1579_v7, %v617_v34  ;;  %1381 = vmatprep.mubr.f32.mxu1 %v1617_v36 }
 0x442   :  { %v1621_v39 = vadd.f32 %v621_v37, %v619_v38  ;;  %v1150_v37 = vsub.s32 7, %v1563_v42  ;;  %v381_v38 = vld [vmem:[#allocation4 + $0x578] sm:$0xff] }
 0x444   :  { %1382 = vmatmul.mubr.f32.vlgmr.msra.gmra.mxu1 %v1621_v39 }
 0x461   :  { %v768_v40 = vpop.xlane.xlu0 %767 }
 0x462   :  { %v772_v41 = vadd.f32 1e-12, %v768_v40 }
 0x464   :  { %1461 = vrcp.f32 %v772_v41  ;;  %v1151_v41 = vrot.slane %v1567_v53, %v1150_v37  ;;  %v1171_v53 = vrot.slane %v381_v38, %v390_v55 }
 0x465   :  { %v771_v6 = vpop.xlane.xlu0 %770 }
 0x466   :  { %v773_v45 = vadd.f32 1e-12, %v771_v6  ;;  %v1157_v6 = vrot.slane %v381_v38, %v384_v50 }
 0x468   :  { %1463 = vrcp.f32 %v773_v45 }
 0x471   :  { %v1462_v43 = vpop.eup %1461 }
 0x472   :  { %v776_v44 = vmul.f32 %v1462_v43, %v764_v17 }
 0x474   :  { %1388 = vmatprep.mubr.msk.f32.mxu0 %vm55_vm0, %v776_v44  ;;  %1430 = vmatprep.mubr.msk.f32.mxu1 %vm55_vm0, %v776_v44 }
 0x475   :  { %v1464_v46 = vpop.eup %1463 }
 0x476   :  { %v1626_v49 = vmul.f32 %v1464_v46, %v765_v20 }
 0x504   :  { %v1383_v7 = vpop.f32.mrf.mxu1 }
 0x505   :  { %1384 = vmatprep.subr.mxu0 %v1383_v7 }
 0x506   :  { %v860_v47 = vpop.f32.mrf.mxu1  ;;  %1385 = vmatpush3.msra.mxu0 %v1383_v7 }
 0x507   :  { %1386 = vmatprep.subr.mxu0 %v860_v47 }
 0x508   :  { %1387 = vmatpush3.msra.mxu0 %v860_v47  ;;  %v1159_v47 = vmul.f32 %v1157_v6, %v1621_v39 }
 0x509   :  { %1389 = vmatmul.mubr.msk.f32.vlgmr.msra.gmra.mxu0 %vm55_vm0, %v1626_v49  ;;  %1391 = vmatprep.subr.mxu0 %v981_v48 }
 0x50a   :  { %1392 = vmatpush3.msra.mxu0 %v981_v48 }
 0x50b   :  { %1393 = vmatprep.subr.mxu0 %v980_v51 }
 0x50c   :  { %1394 = vmatpush3.msra.mxu0 %v980_v51 }
 0x50d   :  { %1395 = vmatprep.subr.mxu0 %v979_v52 }
 0x50e   :  { %1396 = vmatpush3.msra.mxu0 %v979_v52  ;;  %v1158_v52 = vmul.f32 %v1157_v6, %v1617_v36 }
 0x50f   :  { %1397 = vmatprep.subr.mxu0 %v978_v54 }
 0x510   :  { %1398 = vmatpush3.msra.mxu0 %v978_v54 }
 0x511   :  { %1399 = vmatprep.subr.mxu0 %v977_v56 }
 0x512   :  { %1400 = vmatpush3.msra.mxu0 %v977_v56 }
 0x513   :  { %1401 = vmatprep.subr.mxu0 %v976_v57 }
 0x514   :  { %1402 = vmatpush3.msra.mxu0 %v976_v57 }
 0x515   :  { %1403 = vmatprep.subr.mxu0 %v975_v58 }
 0x516   :  { %1404 = vmatpush3.msra.mxu0 %v975_v58 }
 0x517   :  { %1405 = vmatprep.subr.mxu0 %v974_v59 }
 0x518   :  { %1406 = vmatpush3.msra.mxu0 %v974_v59 }
 0x519   :  { %1407 = vmatprep.subr.mxu0 %v973_v60 }
 0x51a   :  { %1408 = vmatpush3.msra.mxu0 %v973_v60 }
 0x51b   :  { %1409 = vmatprep.subr.mxu0 %v972_v61 }
 0x51c   :  { %1410 = vmatpush3.msra.mxu0 %v972_v61 }
 0x51d   :  { %1411 = vmatprep.subr.mxu0 %v971_v62 }
 0x51e   :  { %1412 = vmatpush3.msra.mxu0 %v971_v62 }
 0x51f   :  { %1413 = vmatprep.subr.mxu0 %v970_v63 }
 0x520   :  { %1414 = vmatpush3.msra.mxu0 %v970_v63 }
 0x521   :  { %1415 = vmatprep.subr.mxu0 %v969_v0 }
 0x522   :  { %1416 = vmatpush3.msra.mxu0 %v969_v0 }
 0x523   :  { %1417 = vmatprep.subr.mxu0 %v968_v1 }
 0x524   :  { %1418 = vmatpush3.msra.mxu0 %v968_v1 }
 0x525   :  { %1419 = vmatprep.subr.mxu0 %v967_v2 }
 0x526   :  { %1420 = vmatpush3.msra.mxu0 %v967_v2 }
 0x527   :  { %1421 = vmatprep.subr.mxu0 %v966_v3 }
 0x528   :  { %1422 = vmatpush3.msra.mxu0 %v966_v3 }
 0x5c9   :  { %v1390_v8 = vpop.f32.mrf.mxu0 }
 0x5ca   :  { %v951_v9 = vadd.f32 %v1390_v8, %v872_v5 }
 0x5cb   :  { %v945_v10 = vpop.f32.mrf.mxu0 }
 0x5cc   :  { %v957_v11 = vmin.f32 %v951_v9, 0.0  ;;  %v946_v12 = vadd.f32 %v945_v10, %v872_v5  ;;  %vm955_vm5 = vcmp.gt.f32.partialorder %v951_v9, 0.0 }
 0x5ce   :  { %v960_v13 = vmul.f32 1.442695, %v957_v11  ;;  %v956_v14 = vmin.f32 %v946_v12, 0.0  ;;  %vm954_vm4 = vcmp.gt.f32.partialorder %v946_v12, 0.0 }
 0x5d0   :  { %1465 = vpow2.f32 %v960_v13  ;;  %v958_v15 = vmul.f32 1.442695, %v956_v14 }
 0x5d2   :  { %1467 = vpow2.f32 %v958_v15 }
 0x5dd   :  { %v1466_v16 = vpop.eup %1465 }
 0x5de   :  { %v1214_v18 = vadd.f32 -1.0, %v1466_v16 }
 0x5df   :  { %v1468_v17 = vpop.eup %1467 }
 0x5e0   :  { %v1213_v19 = vadd.f32 -1.0, %v1468_v17  ;;  %v965_v21 = vsel %vm955_vm5, %v951_v9, %v1214_v18 }
 0x5e2   :  { %v964_v20 = vsel %vm954_vm4, %v946_v12, %v1213_v19 }
 0x5e3   :  { %1423 = vmatprep.mubr.f32.mxu0 %v964_v20 }
 0x5e4   :  { %1424 = vmatmul.mubr.f32.vlgmr.msra.gmra.mxu0 %v965_v21 }
 0x6a4   :  { %v1425_v23 = vpop.f32.mrf.mxu0 }
 0x6a5   :  { %1426 = vmatprep.subr.mxu1 %v1425_v23 }
 0x6a6   :  { %v1048_v24 = vpop.f32.mrf.mxu0  ;;  %1427 = vmatpush3.msra.mxu1 %v1425_v23 }
 0x6a7   :  { %1428 = vmatprep.subr.mxu1 %v1048_v24 }
 0x6a8   :  { %1429 = vmatpush3.msra.mxu1 %v1048_v24 }
 0x6a9   :  { %1431 = vmatmul.mubr.msk.f32.vlgmr.msra.gmra.mxu1 %vm55_vm0, %v1626_v49 }
 0x769   :  { %v1432_v27 = vpop.f32.mrf.mxu1 }
 0x76a   :  { %v1133_v22 = vadd.f32 %v1432_v27, %v1060_v26 }
 0x76b   :  { %v1127_v28 = vpop.f32.mrf.mxu1 }
 0x76c   :  { %v1139_v29 = vmin.f32 %v1133_v22, 0.0  ;;  %v1128_v30 = vadd.f32 %v1127_v28, %v1060_v26  ;;  %vm1137_vm6 = vcmp.gt.f32.partialorder %v1133_v22, 0.0 }
 0x76e   :  { %v1142_v31 = vmul.f32 1.442695, %v1139_v29  ;;  %v1138_v32 = vmin.f32 %v1128_v30, 0.0  ;;  %vm1136_vm7 = vcmp.gt.f32.partialorder %v1128_v30, 0.0 }
 0x770   :  { %1469 = vpow2.f32 %v1142_v31  ;;  %v1140_v34 = vmul.f32 1.442695, %v1138_v32 }
 0x772   :  { %1471 = vpow2.f32 %v1140_v34 }
 0x77d   :  { %v1470_v40 = vpop.eup %1469 }
 0x77e   :  { %v1218_v43 = vadd.f32 -1.0, %v1470_v40 }
 0x77f   :  { %v1472_v44 = vpop.eup %1471 }
 0x780   :  { %v1147_v45 = vsel %vm1137_vm6, %v1133_v22, %v1218_v43  ;;  %v1217_v46 = vadd.f32 -1.0, %v1472_v44 }
 0x781   :  { %v1153_v7 = vmul.f32 %v1151_v41, %v1147_v45 }
 0x782   :  { %v1146_v48 = vsel %vm1136_vm7, %v1128_v30, %v1217_v46 }
 0x783   :  { %v1161_v49 = vadd.f32 %v1159_v47, %v1153_v7  ;;  %v1152_v51 = vmul.f32 %v1151_v41, %v1146_v48 }
 0x785   :  { %1164 = vadd.xlane.f32.xlu0 %v1161_v49  ;;  %v1160_v54 = vadd.f32 %v1158_v52, %v1152_v51 }
 0x789   :  { %1162 = vadd.xlane.f32.xlu0 %v1160_v54 }
 0x79f   :  { %1173 = vrot.lane.b32.xlu0 %v1171_v53, %s1527_s24 }
 0x80e   :  { %v1165_v50 = vpop.xlane.xlu0 %1164 }
 0x80f   :  { %v1167_v39 = vadd.f32 %v1165_v50, %v1560_v35 }
 0x812   :  { %v1163_v56 = vpop.xlane.xlu0 %1162 }
 0x813   :  { %v1166_v57 = vadd.f32 %v1163_v56, %v1558_v33 }
 0x816   :  { %v1174_v58 = vpop.permute.xlu0 %1173 }
 0x817   :  { %v1176_v59 = vadd.f32 %v1174_v58, %v1166_v57  ;;  %v1177_v60 = vadd.f32 %v1174_v58, %v1167_v39 }
 0x819   :  { %1180 = vrot.lane.b32.xlu0 %v1176_v59, %s1528_s25 }
 0x81d   :  { %1182 = vrot.lane.b32.xlu0 %v1177_v60, %s1528_s25 }
 0x88b   :  { %v1181_v36 = vpop.permute.xlu0 %1180 }
 0x88c   :  { %1187 = vst.msk [vmem:[%s1654_s2] sm:$0xff] %vm1186_vm8, %v1181_v36 }
 0x88f   :  { %v1183_v42 = vpop.permute.xlu0 %1182 }
 0x890   :  { %1188 = vst.msk [vmem:[%s1654_s2 + $0x8] sm:$0xff] %vm1186_vm8, %v1183_v42 }
 0x891   :  { %1193 = vsyncpa [#allocation3], 1 }
 0x892   :  { %1194 = vsyncpa [#allocation5], 1 }

</bundles_post_ra>
